<compile_context>
chip_gen: v6e
topology: v6e:2x2x1
jax: 0.10.0
libtpu: 0.0.40
codegen_flags: <defaults>
</compile_context>

<pallas_src>
import functools

import jax
import jax.numpy as jnp
from jax.experimental import pallas as pl
from jax.experimental.pallas import tpu as pltpu

NUM_COORDS = 1024


def _validation_loss_kernel(pad_ref, logits_ref, tgt_ref, coords_ref, out_ref,
                            *, n_rows, tm):
    # pad_ref:    (1,) int32 in SMEM (scalar prefetch)
    # logits_ref: (TM, 1024) tile of the untouched logits, native dtype
    # tgt_ref:    (TM, 1) int32
    # coords_ref: (1, 1024) f32, resident (same block every grid step)
    # out_ref:    (1, 8, 128) f32 per-tile partials: [0,0,0]=loss_sum, [0,0,1]=mask_sum
    x = logits_ref[...].astype(jnp.float32)                 # (TM, 1024)

    # Numerically stable softmax numerator.
    m = jnp.max(x, axis=-1, keepdims=True)
    e = jnp.exp(x - m)

    coords = coords_ref[...]                                 # (1, 1024)
    num = jnp.sum(e * coords, axis=-1, keepdims=True)        # (TM, 1)
    den = jnp.sum(e, axis=-1, keepdims=True)                 # (TM, 1)
    pred = num * pl.reciprocal(den, approx=False)            # expected coordinate

    tgt = tgt_ref[...]                                       # (TM, 1) int32
    coord_pos = tgt < NUM_COORDS

    # Rows past the true N (ragged last tile) hold stale VMEM data; mask them.
    row_id = pl.program_id(0) * tm + jax.lax.broadcasted_iota(jnp.int32, (tm, 1), 0)
    row_valid = row_id < n_rows

    valid = jnp.logical_and(jnp.logical_and(coord_pos, tgt != pad_ref[0]), row_valid)

    target_coords = jnp.where(coord_pos, tgt.astype(jnp.float32), 0.0)
    loss = jnp.abs(pred - target_coords)                     # L1, reduction='none'
    # Use select (not multiply): stale tail rows can make `pred` non-finite and
    # NaN * 0 would poison the sum; where(False, NaN, 0) is exactly 0.
    loss = jnp.where(valid, loss, 0.0)

    loss_sum = jnp.sum(loss)
    mask_sum = jnp.sum(valid.astype(jnp.float32))

    # Lane-dense per-tile partial block: lane 0 = masked L1 sum, lane 1 = mask count.
    lane = jax.lax.broadcasted_iota(jnp.int32, (8, 128), 1)
    tile = jnp.where(lane == 0, loss_sum, jnp.where(lane == 1, mask_sum, 0.0))
    out_ref[...] = tile.reshape(1, 8, 128)


def validation_loss(logits, targets, pad_idx):
    """logits: (N, output_dim >= 1024) float; targets: (N,) int -> scalar f32 loss."""
    n, output_dim = logits.shape
    assert output_dim >= NUM_COORDS, "need at least 1024 coordinate logits"

    # Large row tile for a bandwidth-bound kernel; cap at N rounded up to the
    # sublane multiple so tiny inputs don't allocate an oversized VMEM tile.
    tm = min(512, ((n + 7) // 8) * 8)
    num_blocks = pl.cdiv(n, tm)

    tgt2d = targets.astype(jnp.int32).reshape(n, 1)
    pad_arr = jnp.full((1,), pad_idx, dtype=jnp.int32)
    coords_row = jnp.arange(NUM_COORDS, dtype=jnp.float32).reshape(1, NUM_COORDS)

    kernel = functools.partial(_validation_loss_kernel, n_rows=n, tm=tm)

    partials = pl.pallas_call(
        kernel,
        out_shape=jax.ShapeDtypeStruct((num_blocks, 8, 128), jnp.float32),
        grid_spec=pltpu.PrefetchScalarGridSpec(
            num_scalar_prefetch=1,               # pad_idx -> SMEM
            grid=(num_blocks,),
            in_specs=[
                # Windows the first 1024 columns of the untouched logits array.
                pl.BlockSpec((tm, NUM_COORDS), lambda i, p: (i, 0)),
                pl.BlockSpec((tm, 1), lambda i, p: (i, 0)),
                # Resident coordinate row: same block every step -> loaded once.
                pl.BlockSpec((1, NUM_COORDS), lambda i, p: (0, 0)),
            ],
            out_specs=pl.BlockSpec((1, 8, 128), lambda i, p: (i, 0, 0)),
        ),
        compiler_params=pltpu.CompilerParams(
            dimension_semantics=("parallel",)),   # independent per-tile partials
    )(pad_arr, logits, tgt2d, coords_row)

    loss_sum = jnp.sum(partials[:, 0, 0])
    mask_sum = jnp.sum(partials[:, 0, 1])
    return loss_sum / (mask_sum + 1e-6)


def _reference(logits, targets, pad_idx):
    coord_logits = logits[:, :NUM_COORDS].astype(jnp.float32)
    probs = jax.nn.softmax(coord_logits, axis=-1)
    coord_values = jnp.arange(NUM_COORDS, dtype=jnp.float32)
    pred = jnp.sum(probs * coord_values, axis=-1)
    coord_pos = targets < NUM_COORDS
    tgt = jnp.where(coord_pos, targets.astype(jnp.float32), 0.0)
    loss = jnp.abs(pred - tgt)
    mask = jnp.logical_and(coord_pos, targets != pad_idx).astype(jnp.float32)
    loss = loss * mask
    return loss.sum() / (mask.sum() + 1e-6)


if __name__ == "__main__":
    batch, seq_len = 2, 8
    output_dim = NUM_COORDS + 3     # 1024 coord bins + a few special tokens
    pad_idx = NUM_COORDS + 2        # 1026
    n = batch * seq_len

    key = jax.random.PRNGKey(0)
    k_logits, k_tgt, k_pad = jax.random.split(key, 3)

    logits = jax.random.normal(k_logits, (n, output_dim), dtype=jnp.float32)
    targets = jax.random.randint(k_tgt, (n,), 0, NUM_COORDS, dtype=jnp.int32)
    # Sprinkle some pad tokens so masking is exercised.
    special = jax.random.bernoulli(k_pad, 0.25, (n,))
    targets = jnp.where(special, jnp.int32(pad_idx), targets)

    loss_fn = jax.jit(validation_loss)
    out = jax.block_until_ready(loss_fn(logits, targets, pad_idx))

    ref = _reference(logits, targets, pad_idx)
    assert jnp.allclose(out, ref, rtol=1e-5, atol=1e-4), (out, ref)

    print("KERNEL_OK")
</pallas_src>

<mosaic_0001>
module attributes {stable_mosaic.version = 11 : i64} {
  func.func @_validation_loss_kernel(%arg0: i32, %arg1: memref<1xi32, #tpu.memory_space<smem>>, %arg2: memref<16x1024xf32, #tpu.memory_space<vmem>>, %arg3: memref<16x1xi32, #tpu.memory_space<vmem>>, %arg4: memref<1x1024xf32, #tpu.memory_space<vmem>>, %arg5: memref<1x8x128xf32, #tpu.memory_space<vmem>>) attributes {dimension_semantics = [#tpu.dimension_semantics<parallel>], iteration_bounds = array<i64: 1>, scalar_prefetch = 1 : i64, scratch_operands = 0 : i64, tpu.core_type = #tpu.core_type<tc>, window_params = [{transform_indices = @transform_0, window_bounds = array<i64: 16, 1024>}, {transform_indices = @transform_1, window_bounds = array<i64: 16, 1>}, {pipeline_mode = #tpu.pipeline_mode<synchronous>, transform_indices = @transform_2, window_bounds = array<i64: 1, 1024>}, {transform_indices = @transform_3, window_bounds = array<i64: 1, 8, 128>}]} {
    %c0 = arith.constant 0 : index
    %c0_0 = arith.constant 0 : index
    %0 = vector.load %arg2[%c0, %c0_0] : memref<16x1024xf32, #tpu.memory_space<vmem>>, vector<16x1024xf32>
    %cst = arith.constant dense<0xFF800000> : vector<16xf32>
    %1 = vector.multi_reduction <maximumf>, %0, %cst [1] : vector<16x1024xf32> to vector<16xf32>
    %2 = vector.shape_cast %1 : vector<16xf32> to vector<16x1xf32>
    %3 = vector.broadcast %2 : vector<16x1xf32> to vector<16x1024xf32>
    %4 = arith.subf %0, %3 : vector<16x1024xf32>
    %5 = math.exp %4 : vector<16x1024xf32>
    %c0_1 = arith.constant 0 : index
    %c0_2 = arith.constant 0 : index
    %6 = vector.load %arg4[%c0_1, %c0_2] : memref<1x1024xf32, #tpu.memory_space<vmem>>, vector<1x1024xf32>
    %7 = vector.broadcast %6 : vector<1x1024xf32> to vector<16x1024xf32>
    %8 = arith.mulf %5, %7 : vector<16x1024xf32>
    %cst_3 = arith.constant dense<0.000000e+00> : vector<16xf32>
    %9 = vector.multi_reduction <add>, %8, %cst_3 [1] : vector<16x1024xf32> to vector<16xf32>
    %10 = vector.shape_cast %9 : vector<16xf32> to vector<16x1xf32>
    %cst_4 = arith.constant dense<0.000000e+00> : vector<16xf32>
    %11 = vector.multi_reduction <add>, %5, %cst_4 [1] : vector<16x1024xf32> to vector<16xf32>
    %12 = vector.shape_cast %11 : vector<16xf32> to vector<16x1xf32>
    %13 = tpu.reciprocal %12 : vector<16x1xf32> -> vector<16x1xf32>
    %14 = arith.mulf %10, %13 : vector<16x1xf32>
    %c0_5 = arith.constant 0 : index
    %c0_6 = arith.constant 0 : index
    %15 = vector.load %arg3[%c0_5, %c0_6] : memref<16x1xi32, #tpu.memory_space<vmem>>, vector<16x1xi32>
    %c1024_i32 = arith.constant 1024 : i32
    %16 = vector.broadcast %c1024_i32 : i32 to vector<16x1xi32>
    %17 = arith.cmpi slt, %15, %16 : vector<16x1xi32>
    %c16_i32 = arith.constant 16 : i32
    %18 = arith.muli %arg0, %c16_i32 : i32
    %19 = tpu.iota {dimensions = array<i32: 0>} : vector<16x1xi32>
    %20 = vector.broadcast %18 : i32 to vector<16x1xi32>
    %21 = arith.addi %20, %19 : vector<16x1xi32>
    %c16_i32_7 = arith.constant 16 : i32
    %22 = vector.broadcast %c16_i32_7 : i32 to vector<16x1xi32>
    %23 = arith.cmpi slt, %21, %22 : vector<16x1xi32>
    %c0_8 = arith.constant 0 : index
    %24 = memref.load %arg1[%c0_8] : memref<1xi32, #tpu.memory_space<smem>>
    %25 = vector.broadcast %24 : i32 to vector<16x1xi32>
    %26 = arith.cmpi ne, %15, %25 : vector<16x1xi32>
    %27 = arith.andi %17, %26 : vector<16x1xi1>
    %28 = arith.andi %27, %23 : vector<16x1xi1>
    %29 = arith.sitofp %15 : vector<16x1xi32> to vector<16x1xf32>
    %cst_9 = arith.constant 0.000000e+00 : f32
    %30 = vector.broadcast %cst_9 : f32 to vector<16x1xf32>
    %31 = arith.select %17, %29, %30 : vector<16x1xi1>, vector<16x1xf32>
    %32 = arith.subf %14, %31 : vector<16x1xf32>
    %33 = math.absf %32 : vector<16x1xf32>
    %cst_10 = arith.constant 0.000000e+00 : f32
    %34 = vector.broadcast %cst_10 : f32 to vector<16x1xf32>
    %35 = arith.select %28, %33, %34 : vector<16x1xi1>, vector<16x1xf32>
    %36 = vector.shape_cast %35 : vector<16x1xf32> to vector<1x16x1xf32>
    %cst_11 = arith.constant dense<0.000000e+00> : vector<1xf32>
    %37 = vector.multi_reduction <add>, %36, %cst_11 [1, 2] : vector<1x16x1xf32> to vector<1xf32>
    %38 = vector.shape_cast %37 : vector<1xf32> to vector<1x1x1xf32>
    %39 = vector.extract %38[0, 0, 0] : f32 from vector<1x1x1xf32>
    %40 = arith.extui %28 : vector<16x1xi1> to vector<16x1xi32>
    %41 = arith.sitofp %40 : vector<16x1xi32> to vector<16x1xf32>
    %42 = vector.shape_cast %41 : vector<16x1xf32> to vector<1x16x1xf32>
    %cst_12 = arith.constant dense<0.000000e+00> : vector<1xf32>
    %43 = vector.multi_reduction <add>, %42, %cst_12 [1, 2] : vector<1x16x1xf32> to vector<1xf32>
    %44 = vector.shape_cast %43 : vector<1xf32> to vector<1x1x1xf32>
    %45 = vector.extract %44[0, 0, 0] : f32 from vector<1x1x1xf32>
    %46 = tpu.iota {dimensions = array<i32: 1>} : vector<8x128xi32>
    %c0_i32 = arith.constant 0 : i32
    %47 = vector.broadcast %c0_i32 : i32 to vector<8x128xi32>
    %48 = arith.cmpi eq, %46, %47 : vector<8x128xi32>
    %c1_i32 = arith.constant 1 : i32
    %49 = vector.broadcast %c1_i32 : i32 to vector<8x128xi32>
    %50 = arith.cmpi eq, %46, %49 : vector<8x128xi32>
    %cst_13 = arith.constant 0.000000e+00 : f32
    %51 = vector.broadcast %45 : f32 to vector<8x128xf32>
    %52 = vector.broadcast %cst_13 : f32 to vector<8x128xf32>
    %53 = arith.select %50, %51, %52 : vector<8x128xi1>, vector<8x128xf32>
    %54 = vector.broadcast %39 : f32 to vector<8x128xf32>
    %55 = arith.select %48, %54, %53 : vector<8x128xi1>, vector<8x128xf32>
    %56 = vector.shape_cast %55 : vector<8x128xf32> to vector<1x8x128xf32>
    %c0_14 = arith.constant 0 : index
    %c0_15 = arith.constant 0 : index
    %c0_16 = arith.constant 0 : index
    %57 = vector.load %arg5[%c0_14, %c0_15, %c0_16] : memref<1x8x128xf32, #tpu.memory_space<vmem>>, vector<1x8x128xf32>
    tpu.vector_store %arg5[%c0_14, %c0_15, %c0_16], %56 {strides = array<i32>} : memref<1x8x128xf32, #tpu.memory_space<vmem>>, vector<1x8x128xf32>,
    return
  }
  func.func @transform_0(%arg0: i32, %arg1: memref<1xi32, #tpu.memory_space<smem>>) -> (i32, i32) {
    %c0_i32 = arith.constant 0 : i32
    %c0_i32_0 = arith.constant 0 : i32
    return %arg0, %c0_i32 : i32, i32
  }
  func.func @transform_1(%arg0: i32, %arg1: memref<1xi32, #tpu.memory_space<smem>>) -> (i32, i32) {
    %c0_i32 = arith.constant 0 : i32
    %c0_i32_0 = arith.constant 0 : i32
    return %arg0, %c0_i32 : i32, i32
  }
  func.func @transform_2(%arg0: i32, %arg1: memref<1xi32, #tpu.memory_space<smem>>) -> (i32, i32) {
    %c0_i32 = arith.constant 0 : i32
    %c0_i32_0 = arith.constant 0 : i32
    %c0_i32_1 = arith.constant 0 : i32
    return %c0_i32, %c0_i32_0 : i32, i32
  }
  func.func @transform_3(%arg0: i32, %arg1: memref<1xi32, #tpu.memory_space<smem>>) -> (i32, i32, i32) {
    %c0_i32 = arith.constant 0 : i32
    %c0_i32_0 = arith.constant 0 : i32
    %c0_i32_1 = arith.constant 0 : i32
    return %arg0, %c0_i32, %c0_i32_0 : i32, i32, i32
  }
}

</mosaic_0001>

<bundles_post_ra>
// kernel: validation_loss.1
= control target key start
LH: loop header
LB: loop body
LE: loop exit
PB: predicated region body
PF: predicated region fallthrough
CT: control target
= control target key end

     0   :  { %10 = vsyncpa [#allocation5], 0  ;;  %s353_s15 = smov [#allocation4]   ;;  %s449_s0 = inlined_call_operand.<no memory space> [shape: s32[1], index: 0, kind: input, shape index: {}]   ;;  %s450_s1 = inlined_call_operand.hbm [shape: f32[16,1027], index: 1, kind: input, shape index: {}]   ;;  %s451_s2 = inlined_call_operand.vmem [shape: s32[16,1], index: 2, kind: input, shape index: {}]   ;;  %s452_s3 = inlined_call_operand.vmem [shape: f32[1,1024], index: 3, kind: input, shape index: {}]   ;;  %s453_s4 = inlined_call_operand.vmem [shape: f32[1,8,128], index: 4, kind: output, shape index: {}]  }
   0x1   :  { %s16_s16 = sshll.u32 %s353_s15, 4  ;;  %s17_s16 = int_to_ptr.vmem [resolvable:$true] %s16_s16 }
   0x2   :  { %s339_s17 = scalar_lea.vmem %s17_s16, 2048  ;;  %p344_p1 = scmp.lt.s32.totalorder %s17_s16, %s17_s16 }
   0x3   :  { %p340_p0 = scmp.ne.s32.totalorder %s17_s16, %s339_s17  ;;  %p345_p2 = scmp.lt.s32.totalorder %s339_s17, %s339_s17 }
   0x5   :  { %p346_p3 = por %p345_p2, %p344_p1 }
   0x7   :  { %p347_p4 = pnand %p346_p3, %p340_p0 }
   0x9   :  { %350 = shalt.err (!%p347_p4)
}
   0xa   :  { %s354_s18 = smov 1152   ;;  %s355_s19 = smov 1024  }
   0xb   :  { %s356_s20 = smov 64  }
   0xc   :  { %22 = dma.hbm_to_vmem [thread:$0]  %s450_s1, 2048, %s17_s16, [#allocation5], %s354_s18, %s355_s19, %s356_s20  }
   0xd   :  { %351 = dma.done.wait [#allocation5], 2048  }
   0xe   :  { %352 = vsyncadd [#allocation5], 4294965248  ;;  %v30_v0 = vld [vmem:[#allocation4] sm:$0xff]  ;;  %v31_v1 = vld [vmem:[#allocation4 + $0x8] sm:$0xff]  ;;  %v114_v31 = vlaneseq  ;;  %vm241_vm4 = vcmask 7168  }
   0xf   :  { %v32_v2 = vld [vmem:[#allocation4 + $0x10] sm:$0xff]  ;;  %v33_v3 = vld [vmem:[#allocation4 + $0x18] sm:$0xff]  ;;  %v34_v4 = vld [vmem:[#allocation4 + $0x20] sm:$0xff] }
  0x10   :  { %v35_v5 = vld [vmem:[#allocation4 + $0x28] sm:$0xff]  ;;  %v46_v6 = vmax.f32 %v30_v0, %v32_v2  ;;  %v386_v7 = vld [vmem:[#allocation4 + $0x30] sm:$0xff]  ;;  %v388_v8 = vld [vmem:[#allocation4 + $0x38] sm:$0xff]  ;;  %v47_v9 = vmax.f32 %v31_v1, %v33_v3  ;;  %v399_v42 = vshrl.u32 %v114_v31, 7 }
  0x11   :  { %v38_v10 = vld [vmem:[#allocation4 + $0x40] sm:$0xff]  ;;  %v39_v12 = vld [vmem:[#allocation4 + $0x48] sm:$0xff]  ;;  %v40_v13 = vld [vmem:[#allocation4 + $0x50] sm:$0xff] }
  0x12   :  { %v48_v11 = vmax.f32 %v46_v6, %v34_v4  ;;  %v41_v14 = vld [vmem:[#allocation4 + $0x58] sm:$0xff]  ;;  %v49_v15 = vmax.f32 %v47_v9, %v35_v5  ;;  %v42_v16 = vld [vmem:[#allocation4 + $0x60] sm:$0xff]  ;;  %v43_v17 = vld [vmem:[#allocation4 + $0x68] sm:$0xff]  ;;  %v55_v18 = vmax.f32 %v38_v10, %v40_v13  ;;  %v116_v59 = vsub.s32 0, %v399_v42 }
  0x13   :  { %v56_v19 = vmax.f32 %v39_v12, %v41_v14  ;;  %v391_v21 = vld [vmem:[#allocation4 + $0x70] sm:$0xff]  ;;  %v393_v22 = vld [vmem:[#allocation4 + $0x78] sm:$0xff]  ;;  %v112_v61 = vld [vmem:[%s452_s3] sm:$0xff]  ;;  %v120_v62 = vsub.s32 1, %v399_v42 }
  0x14   :  { %v50_v20 = vmax.f32 %v48_v11, %v386_v7  ;;  %v51_v23 = vmax.f32 %v49_v15, %v388_v8  ;;  %v57_v24 = vmax.f32 %v55_v18, %v42_v16 }
  0x15   :  { %v58_v25 = vmax.f32 %v56_v19, %v43_v17  ;;  %v121_v6 = vrot.slane %v112_v61, %v120_v62  ;;  %v136_v19 = vsub.s32 5, %v399_v42 }
  0x16   :  { %v52_v26 = vmax.f32 %v50_v20, %v51_v23  ;;  %v59_v27 = vmax.f32 %v57_v24, %v391_v21 }
  0x17   :  { %v60_v28 = vmax.f32 %v58_v25, %v393_v22 }
  0x18   :  { %53 = vmax.xlane.f32.xlu0 %v52_v26  ;;  %v140_v26 = vsub.s32 6, %v399_v42 }
  0x19   :  { %v61_v29 = vmax.f32 %v59_v27, %v60_v28 }
  0x1c   :  { %62 = vmax.xlane.f32.xlu0 %v61_v29 }
  0xa1   :  { %v54_v30 = vpop.xlane.xlu0 %53 }
  0xa2   :  { %v64_v32 = vsub.f32 %v30_v0, %v54_v30  ;;  %v65_v33 = vsub.f32 %v31_v1, %v54_v30  ;;  %v66_v34 = vsub.f32 %v32_v2, %v54_v30  ;;  %v67_v35 = vsub.f32 %v33_v3, %v54_v30 }
  0xa3   :  { %v68_v39 = vsub.f32 %v34_v4, %v54_v30  ;;  %v69_v48 = vsub.f32 %v35_v5, %v54_v30  ;;  %v70_v53 = vsub.f32 %v386_v7, %v54_v30  ;;  %v71_v55 = vsub.f32 %v388_v8, %v54_v30 }
  0xa4   :  { %v80_v36 = vmul.f32 1.442695, %v64_v32  ;;  %v82_v37 = vmul.f32 1.442695, %v65_v33  ;;  %v84_v38 = vmul.f32 1.442695, %v66_v34  ;;  %v117_v4 = vrot.slane %v112_v61, %v116_v59 }
  0xa5   :  { %v86_v40 = vmul.f32 1.442695, %v67_v35  ;;  %v63_v41 = vpop.xlane.xlu0 %62  ;;  %v88_v56 = vmul.f32 1.442695, %v68_v39  ;;  %v90_v58 = vmul.f32 1.442695, %v69_v48 }
  0xa6   :  { %295 = vpow2.f32 %v80_v36  ;;  %v72_v43 = vsub.f32 %v38_v10, %v63_v41  ;;  %v73_v44 = vsub.f32 %v39_v12, %v63_v41  ;;  %v74_v45 = vsub.f32 %v40_v13, %v63_v41 }
  0xa7   :  { %297 = vpow2.f32 %v82_v37  ;;  %v75_v46 = vsub.f32 %v41_v14, %v63_v41  ;;  %v76_v47 = vsub.f32 %v42_v16, %v63_v41  ;;  %v77_v57 = vsub.f32 %v43_v17, %v63_v41 }
  0xa8   :  { %299 = vpow2.f32 %v84_v38  ;;  %v96_v49 = vmul.f32 1.442695, %v72_v43  ;;  %v98_v50 = vmul.f32 1.442695, %v73_v44  ;;  %v100_v51 = vmul.f32 1.442695, %v74_v45 }
  0xa9   :  { %301 = vpow2.f32 %v86_v40  ;;  %v102_v52 = vmul.f32 1.442695, %v75_v46  ;;  %v104_v54 = vmul.f32 1.442695, %v76_v47  ;;  %v92_v60 = vmul.f32 1.442695, %v70_v53 }
  0xaa   :  { %303 = vpow2.f32 %v96_v49  ;;  %v78_v63 = vsub.f32 %v391_v21, %v63_v41  ;;  %v94_v0 = vmul.f32 1.442695, %v71_v55  ;;  %v124_v1 = vsub.s32 2, %v399_v42 }
  0xab   :  { %305 = vpow2.f32 %v98_v50  ;;  %v79_v2 = vsub.f32 %v393_v22, %v63_v41  ;;  %v106_v3 = vmul.f32 1.442695, %v77_v57  ;;  %v128_v5 = vsub.s32 3, %v399_v42 }
  0xac   :  { %307 = vpow2.f32 %v100_v51  ;;  %v108_v7 = vmul.f32 1.442695, %v78_v63  ;;  %v125_v9 = vrot.slane %v112_v61, %v124_v1  ;;  %v132_v13 = vsub.s32 4, %v399_v42 }
  0xad   :  { %309 = vpow2.f32 %v102_v52  ;;  %v110_v10 = vmul.f32 1.442695, %v79_v2  ;;  %v129_v12 = vrot.slane %v112_v61, %v128_v5  ;;  %v137_v36 = vrot.slane %v112_v61, %v136_v19  ;;  %v211_v19 = vld [vmem:[%s451_s2 + $0x8] sm:$0xff] }
  0xae   :  { %311 = vpow2.f32 %v104_v54  ;;  %v133_v25 = vrot.slane %v112_v61, %v132_v13  ;;  %v144_v37 = vsub.s32 7, %v399_v42  ;;  %v141_v45 = vrot.slane %v112_v61, %v140_v26 }
  0xaf   :  { %313 = vpow2.f32 %v88_v56  ;;  %vm213_vm1 = vcmp.lt.s32.totalorder %v211_v19, 1024 }
  0xb0   :  { %315 = vpow2.f32 %v90_v58  ;;  %v145_v52 = vrot.slane %v112_v61, %v144_v37 }
  0xb1   :  { %317 = vpow2.f32 %v92_v60 }
  0xb2   :  { %319 = vpow2.f32 %v94_v0 }
  0xb3   :  { %v296_v8 = vpop.eup %295  ;;  %321 = vpow2.f32 %v106_v3 }
  0xb4   :  { %v298_v11 = vpop.eup %297  ;;  %v154_v14 = vmul.f32 %v296_v8, %v117_v4  ;;  %323 = vpow2.f32 %v108_v7 }
  0xb5   :  { %v300_v15 = vpop.eup %299  ;;  %v188_v16 = vadd.f32 %v298_v11, %v296_v8  ;;  %v155_v17 = vmul.f32 %v298_v11, %v121_v6  ;;  %325 = vpow2.f32 %v110_v10 }
  0xb6   :  { %v302_v18 = vpop.eup %301  ;;  %v156_v22 = vmul.f32 %v300_v15, %v125_v9 }
  0xb7   :  { %v304_v20 = vpop.eup %303  ;;  %v189_v21 = vadd.f32 %v300_v15, %v188_v16  ;;  %v170_v23 = vadd.f32 %v155_v17, %v154_v14  ;;  %v157_v27 = vmul.f32 %v302_v18, %v129_v12  ;;  %v210_v16 = vld [vmem:[%s451_s2] sm:$0xff] }
  0xb8   :  { %v306_v24 = vpop.eup %305  ;;  %v162_v28 = vmul.f32 %v304_v20, %v117_v4  ;;  %vm212_vm0 = vcmp.lt.s32.totalorder %v210_v16, 1024  ;;  %v231_v17 = vcvt.s32.f32 %v210_v16 }
  0xb9   :  { %v308_v29 = vpop.eup %307  ;;  %v190_v30 = vadd.f32 %v302_v18, %v189_v21  ;;  %v171_v32 = vadd.f32 %v170_v23, %v156_v22  ;;  %v197_v33 = vadd.f32 %v306_v24, %v304_v20  ;;  %v163_v34 = vmul.f32 %v306_v24, %v121_v6 }
  0xba   :  { %v310_v35 = vpop.eup %309  ;;  %v164_v41 = vmul.f32 %v308_v29, %v125_v9  ;;  %v233_v18 = vsel %vm212_vm0, %v231_v17, 0.0  ;;  %v232_v20 = vcvt.s32.f32 %v211_v19  ;;  %v224_v22 = vstv %s449_s0 }
  0xbb   :  { %v312_v38 = vpop.eup %311  ;;  %v172_v39 = vadd.f32 %v171_v32, %v157_v27  ;;  %v198_v40 = vadd.f32 %v308_v29, %v197_v33  ;;  %v179_v43 = vadd.f32 %v163_v34, %v162_v28  ;;  %v165_v53 = vmul.f32 %v310_v35, %v129_v12 }
  0xbc   :  { %v314_v44 = vpop.eup %313  ;;  %v166_v59 = vmul.f32 %v312_v38, %v133_v25  ;;  %v234_v21 = vsel %vm213_vm1, %v232_v20, 0.0  ;;  %vm225_vm2 = vcmp.ne.s32.totalorder %v210_v16, %v224_v22  ;;  %vm226_vm3 = vcmp.ne.s32.totalorder %v211_v19, %v224_v22 }
  0xbd   :  { %v316_v46 = vpop.eup %315  ;;  %v191_v47 = vadd.f32 %v314_v44, %v190_v30  ;;  %v158_v48 = vmul.f32 %v314_v44, %v133_v25  ;;  %v199_v49 = vadd.f32 %v310_v35, %v198_v40  ;;  %v180_v50 = vadd.f32 %v179_v43, %v164_v41  ;;  %vm425_vm5 = vmand %vm212_vm0, %vm225_vm2 }
  0xbe   :  { %v318_v51 = vpop.eup %317  ;;  %v159_v56 = vmul.f32 %v316_v46, %v137_v36  ;;  %vm429_vm6 = vmand %vm213_vm1, %vm226_vm3  ;;  %v357_v25 = vmov 0.0  }
  0xbf   :  { %v320_v54 = vpop.eup %319  ;;  %v192_v55 = vadd.f32 %v316_v46, %v191_v47  ;;  %v173_v57 = vadd.f32 %v172_v39, %v158_v48  ;;  %v200_v42 = vadd.f32 %v312_v38, %v199_v49  ;;  %v181_v60 = vadd.f32 %v180_v50, %v165_v53 }
  0xc0   :  { %v322_v58 = vpop.eup %321  ;;  %v160_v63 = vmul.f32 %v318_v51, %v141_v45  ;;  %v161_v6 = vmul.f32 %v320_v54, %v145_v52  ;;  %v284_v26 = vsel %vm425_vm5, 1.0, %v357_v25  ;;  %v285_v27 = vsel %vm429_vm6, 1.0, %v357_v25 }
  0xc1   :  { %v193_v62 = vadd.f32 %v318_v51, %v192_v55  ;;  %v174_v0 = vadd.f32 %v173_v57, %v159_v56  ;;  %v201_v1 = vadd.f32 %v322_v58, %v200_v42  ;;  %v324_v2 = vpop.eup %323  ;;  %v167_v3 = vmul.f32 %v322_v58, %v137_v36 }
  0xc2   :  { %v182_v4 = vadd.f32 %v181_v60, %v166_v59  ;;  %v326_v8 = vpop.eup %325  ;;  %v168_v12 = vmul.f32 %v324_v2, %v141_v45  ;;  %v258_v28 = vsel %vm241_vm4, %v284_v26, 0.0  ;;  %v259_v29 = vsel %vm241_vm4, %v285_v27, 0.0 }
  0xc3   :  { %v194_v5 = vadd.f32 %v320_v54, %v193_v62  ;;  %v175_v7 = vadd.f32 %v174_v0, %v160_v63  ;;  %v202_v61 = vadd.f32 %v324_v2, %v201_v1  ;;  %v169_v14 = vmul.f32 %v326_v8, %v145_v52 }
  0xc4   :  { %v183_v9 = vadd.f32 %v182_v4, %v167_v3  ;;  %v260_v30 = vadd.f32 %v259_v29, %v258_v28  ;;  %v271_v0 = vand.u32 127, %v114_v31 }
  0xc5   :  { %195 = vadd.xlane.f32.xlu1 %v194_v5  ;;  %v176_v10 = vadd.f32 %v175_v7, %v161_v6  ;;  %v203_v11 = vadd.f32 %v326_v8, %v202_v61 }
  0xc6   :  { %v184_v13 = vadd.f32 %v183_v9, %v168_v12  ;;  %vm273_vm7 = vcmp.eq.s32.totalorder %v271_v0, 1  ;;  %vm272_vm8 = vcmp.eq.s32.totalorder %v271_v0, 0 }
  0xc7   :  { %177 = vadd.xlane.f32.xlu0 %v176_v10 }
  0xc8   :  { %v185_v15 = vadd.f32 %v184_v13, %v169_v14 }
  0xc9   :  { %204 = vadd.xlane.f32.xlu1 %v203_v11 }
  0xcd   :  { %186 = vadd.xlane.f32.xlu1 %v185_v15 }
  0xd1   :  { %261 = vadd.xlane.f32.xlu1 %v260_v30 }
 0x14e   :  { %v196_v32 = vpop.xlane.xlu1 %195 }
 0x14f   :  { %327 = vrcp.f32 %v196_v32 }
 0x150   :  { %v178_v35 = vpop.xlane.xlu0 %177 }
 0x152   :  { %v205_v33 = vpop.xlane.xlu1 %204 }
 0x153   :  { %329 = vrcp.f32 %v205_v33 }
 0x156   :  { %v187_v39 = vpop.xlane.xlu1 %186 }
 0x15a   :  { %v262_v50 = vpop.xlane.xlu1 %261 }
 0x15b   :  { %v263_v51 = vrot.slane %v262_v50, 4 }
 0x15c   :  { %v328_v34 = vpop.eup %327 }
 0x15d   :  { %v208_v36 = vmul.f32 %v328_v34, %v178_v35  ;;  %v264_v52 = vadd.f32 %v263_v51, %v262_v50 }
 0x15f   :  { %v235_v37 = vsub.f32 %v208_v36, %v233_v18  ;;  %v265_v53 = vrot.slane %v264_v52, 2 }
 0x160   :  { %v330_v38 = vpop.eup %329 }
 0x161   :  { %v237_v40 = vand.u32 2147483647, %v235_v37  ;;  %v209_v41 = vmul.f32 %v330_v38, %v187_v39  ;;  %v266_v57 = vadd.f32 %v265_v53, %v264_v52 }
 0x163   :  { %v236_v43 = vsub.f32 %v209_v41, %v234_v21  ;;  %v239_v45 = vsel %vm425_vm5, %v237_v40, 0.0  ;;  %v267_v59 = vrot.slane %v266_v57, 1 }
 0x164   :  { %v242_v47 = vsel %vm241_vm4, %v239_v45, 0.0 }
 0x165   :  { %v238_v44 = vand.u32 2147483647, %v236_v43  ;;  %v268_v63 = vadd.f32 %v267_v59, %v266_v57 }
 0x167   :  { %v240_v46 = vsel %vm429_vm6, %v238_v44, 0.0 }
 0x168   :  { %v243_v48 = vsel %vm241_vm4, %v240_v46, 0.0 }
 0x169   :  { %v244_v49 = vadd.f32 %v243_v48, %v242_v47 }
 0x16b   :  { %245 = vadd.xlane.f32.xlu0 %v244_v49 }
 0x1f4   :  { %v246_v54 = vpop.xlane.xlu0 %245 }
 0x1f5   :  { %v247_v55 = vrot.slane %v246_v54, 4 }
 0x1f7   :  { %v248_v56 = vadd.f32 %v247_v55, %v246_v54 }
 0x1f9   :  { %v249_v42 = vrot.slane %v248_v56, 2 }
 0x1fb   :  { %v250_v58 = vadd.f32 %v249_v42, %v248_v56 }
 0x1fd   :  { %v251_v60 = vrot.slane %v250_v58, 1 }
 0x1ff   :  { %v252_v62 = vadd.f32 %v251_v60, %v250_v58 }
 0x201   :  { %286 = vpush %v252_v62 }
 0x202   :  { %288 = vpush %v268_v63 }
 0x232   :  { %s287_s0 = spop %286 }
 0x233   :  { %v276_v1 = vstv %s287_s0  ;;  %s289_s2 = spop %288 }
 0x234   :  { %v274_v2 = vstv %s289_s2 }
 0x235   :  { %v275_v3 = vsel %vm273_vm7, %v274_v2, 0.0 }
 0x236   :  { %v277_v4 = vsel %vm272_vm8, %v276_v1, %v275_v3 }
 0x237   :  { %278 = vst [vmem:[%s453_s4] sm:$0xff] %v277_v4 }
 0x238   :  { %283 = vsyncpa [#allocation5], 1 }

</bundles_post_ra>
